<compile_context>
chip_gen: v7x
topology: tpu7x:2x2x1
jax: 0.10.0
libtpu: 0.0.40
codegen_flags: <defaults>
</compile_context>

<pallas_src>
import functools
import math

import numpy as np
import jax
import jax.numpy as jnp
from jax.experimental import pallas as pl
from jax.experimental.pallas import tpu as pltpu


def _interp_matrix(start, bin_size, n_cells, P, S):
    """Build the (P, n_cells) matrix A such that, for a 1-D signal f of length
    n_cells,  (A @ f)[p] = mean over S bilinear samples inside output bin p.
    Matches torchvision/detectron2 ROIAlign (aligned=True) sampling exactly.
    Pure jnp, vmappable over (start, bin_size)."""
    cells = jax.lax.broadcasted_iota(jnp.int32, (P, n_cells), 1).astype(jnp.float32)
    ph = jax.lax.broadcasted_iota(jnp.int32, (P, n_cells), 0).astype(jnp.float32)
    nc = float(n_cells)
    acc = jnp.zeros((P, n_cells), jnp.float32)
    for s in range(S):  # static unroll over sampling points per bin
        coord = start + ph * bin_size + (s + 0.5) * bin_size / S
        valid = (coord >= -1.0) & (coord <= nc)
        c = jnp.maximum(coord, 0.0)
        low = jnp.floor(c)
        at_edge = low >= (nc - 1.0)
        low = jnp.where(at_edge, nc - 1.0, low)
        high = jnp.where(at_edge, low, low + 1.0)
        c = jnp.where(at_edge, low, c)
        lw = c - low
        hw = 1.0 - lw
        w = hw * (cells == low).astype(jnp.float32) + lw * (cells == high).astype(jnp.float32)
        acc = acc + jnp.where(valid, w, 0.0)
    return acc * (1.0 / S)


def _pick_tile_c(C, H, W, itemsize, budget_bytes=12 * 1024 * 1024):
    """Largest channel tile whose (H, W, TILE_C) slab fits a per-buffer VMEM
    budget; must be a multiple of 128 or equal to C (Pallas (8,128) rule)."""
    if C <= 128 or C * H * W * itemsize <= budget_bytes:
        return C
    tc = (budget_bytes // (H * W * itemsize)) // 128 * 128
    # TODO(synk): for very large H*W where even 128 channels exceed the budget,
    # switch to a manual spatial-crop DMA of just the ROI's rows/cols.
    return int(max(128, min(tc, C)))


def _roi_align_kernel(bidx_ref, ay_ref, ax_ref, feat_ref, out_ref, *, P, H, W):
    """One grid step = (channel tile, ROI).  feat_ref is the (1, H, W, TILE_C)
    NHWC slab of the image this ROI belongs to (picked via scalar-prefetched
    batch indices); ay/ax are this ROI's precomputed interpolation matrices."""
    del bidx_ref  # only consumed by the index_maps
    tc = feat_ref.shape[-1]
    f = feat_ref[0]      # (H, W, TC), native feature dtype
    ay = ay_ref[0]       # (P, H),     same dtype as features
    ax = ax_ref[0]       # (P, W)

    # Contract H for all W*TC lanes in a single MXU op (channels folded in lanes).
    t = jnp.dot(ay, f.reshape(H, W * tc),
                preferred_element_type=jnp.float32)          # (P, W*TC) f32
    t3 = t.reshape(P, W, tc).astype(ax.dtype)                # (P, W, TC)

    # Contract W: one lane-dense (P, TC) matmul + contiguous store per output row.
    # TODO(synk): could batch several ROIs per grid step to amortize the ~0.35us
    # per-step overhead further.
    for py in range(P):  # static unroll; P is small (4..14)
        o = jnp.dot(ax, t3[py], preferred_element_type=jnp.float32)  # (P, TC)
        out_ref[0, py] = o.astype(out_ref.dtype)


def _roi_align_level(feat_nchw, boxes, bidx, *, spatial_scale, P, S):
    """ROIAlign (aligned=True) of the given boxes against one feature level.
    Returns (M_l, C, P, P)."""
    N, C, H, W = feat_nchw.shape
    Ml = int(boxes.shape[0])
    dtype = feat_nchw.dtype

    # ROIAlignV2 (aligned=True): scale then shift by -0.5.
    x0 = boxes[:, 0] * spatial_scale - 0.5
    y0 = boxes[:, 1] * spatial_scale - 0.5
    x1 = boxes[:, 2] * spatial_scale - 0.5
    y1 = boxes[:, 3] * spatial_scale - 0.5
    # Precompute per-ROI interpolation matrices off the kernel's critical path.
    ay = jax.vmap(lambda s, b: _interp_matrix(s, b, H, P, S))(y0, (y1 - y0) / P)
    ax = jax.vmap(lambda s, b: _interp_matrix(s, b, W, P, S))(x0, (x1 - x0) / P)
    # Keep the matmul in the features' native dtype (bf16 stays bf16 -> full MXU rate).
    ay = ay.astype(dtype)   # (Ml, P, H)
    ax = ax.astype(dtype)   # (Ml, P, W)

    feat = jnp.transpose(feat_nchw, (0, 2, 3, 1))  # NHWC: channels last (lane-dense)

    tile_c = _pick_tile_c(C, H, W, jnp.dtype(dtype).itemsize)
    n_ct = pl.cdiv(C, tile_c)

    kernel = functools.partial(_roi_align_kernel, P=P, H=H, W=W)
    grid_spec = pltpu.PrefetchScalarGridSpec(
        num_scalar_prefetch=1,          # bidx (Ml,) int32, used only by index_maps
        grid=(n_ct, Ml),                # channel-tile outer, ROI inner (feature reuse)
        in_specs=[
            pl.BlockSpec((1, P, H), lambda ct, m, bidx_ref: (m, 0, 0)),
            pl.BlockSpec((1, P, W), lambda ct, m, bidx_ref: (m, 0, 0)),
            pl.BlockSpec((1, H, W, tile_c),
                         lambda ct, m, bidx_ref: (bidx_ref[m], 0, 0, ct)),
        ],
        out_specs=pl.BlockSpec((1, P, P, tile_c),
                               lambda ct, m, bidx_ref: (m, 0, 0, ct)),
    )
    out = pl.pallas_call(
        kernel,
        out_shape=jax.ShapeDtypeStruct((Ml, P, P, C), dtype),
        grid_spec=grid_spec,
        compiler_params=pltpu.CompilerParams(
            dimension_semantics=("parallel", "parallel"),
            vmem_limit_bytes=64 * 1024 * 1024),
    )(bidx.astype(jnp.int32), ay, ax, feat)

    return jnp.transpose(out, (0, 3, 1, 2))  # -> (Ml, C, P, P)


class ROIPoolerPallas:
    """JAX/Pallas port of detectron2 ROIPooler with pooler_type='ROIAlignV2'."""

    def __init__(self, output_size, scales, sampling_ratio,
                 canonical_box_size=224, canonical_level=4):
        if isinstance(output_size, int):
            output_size = (output_size, output_size)
        assert len(output_size) == 2 and output_size[0] == output_size[1]
        self.output_size = output_size
        self.scales = tuple(float(s) for s in scales)
        self.sampling_ratio = int(sampling_ratio)
        # TODO(synk): sampling_ratio == 0 (adaptive per-box grid via ceil) and the
        # ROIPool / ROIAlignRotated / aligned=False variants are not implemented.
        assert self.sampling_ratio > 0
        min_level = -math.log2(self.scales[0])
        max_level = -math.log2(self.scales[-1])
        assert math.isclose(min_level, int(min_level)) and math.isclose(max_level, int(max_level))
        self.min_level = int(min_level)
        self.max_level = int(max_level)
        assert len(self.scales) == self.max_level - self.min_level + 1
        assert canonical_box_size > 0
        self.canonical_box_size = canonical_box_size
        self.canonical_level = canonical_level

    def __call__(self, x, box_lists):
        num_levels = len(self.scales)
        assert isinstance(x, list) and isinstance(box_lists, list)
        assert len(x) == num_levels
        N, C = x[0].shape[0], x[0].shape[1]
        assert len(box_lists) == N
        P, S = self.output_size[0], self.sampling_ratio

        M = sum(int(b.shape[0]) for b in box_lists)
        if M == 0:
            return jnp.zeros((0, C, P, P), x[0].dtype)

        # convert_boxes_to_pooler_format: concat boxes + per-image batch index.
        boxes = jnp.concatenate([b.astype(jnp.float32) for b in box_lists], axis=0)
        bidx_np = np.concatenate([np.full((int(b.shape[0]),), i, np.int32)
                                  for i, b in enumerate(box_lists)], axis=0)
        bidx = jnp.asarray(bidx_np)

        if num_levels == 1:
            lvl_np = np.zeros((M,), np.int64)
        else:
            # assign_boxes_to_levels
            area = (boxes[:, 2] - boxes[:, 0]) * (boxes[:, 3] - boxes[:, 1])
            lvl = jnp.floor(self.canonical_level +
                            jnp.log2(jnp.sqrt(area) / self.canonical_box_size + 1e-8))
            lvl = jnp.clip(lvl, self.min_level, self.max_level).astype(jnp.int32) - self.min_level
            # Host-side grouping (data-dependent sizes), mirroring torch's
            # nonzero + index_put_. Like the PyTorch module, this is not traceable.
            lvl_np = np.asarray(jax.device_get(lvl))

        output = jnp.zeros((M, C, P, P), x[0].dtype)
        for level, scale in enumerate(self.scales):
            inds = np.nonzero(lvl_np == level)[0]
            if inds.size == 0:
                continue
            # Sort by image index so consecutive ROIs keep the same feature block
            # and Pallas skips the re-DMA of the feature slab.
            inds = inds[np.argsort(bidx_np[inds], kind="stable")]
            pooled = _roi_align_level(x[level], boxes[inds], bidx[inds],
                                      spatial_scale=scale, P=P, S=S)
            output = output.at[inds].set(pooled)
        return output


# ---------------- pure-JAX reference (for correctness check) ----------------
def _roi_align_ref(feat, boxes, bidx, spatial_scale, P, S):
    H, W = feat.shape[2], feat.shape[3]

    def one(box, b):
        x0 = box[0] * spatial_scale - 0.5
        y0 = box[1] * spatial_scale - 0.5
        x1 = box[2] * spatial_scale - 0.5
        y1 = box[3] * spatial_scale - 0.5
        Ay = _interp_matrix(y0, (y1 - y0) / P, H, P, S)
        Ax = _interp_matrix(x0, (x1 - x0) / P, W, P, S)
        fc = jnp.take(feat, b, axis=0)  # (C, H, W)
        return jnp.einsum('ph,chw,qw->cpq', Ay, fc, Ax,
                          precision=jax.lax.Precision.HIGHEST)

    return jax.vmap(one)(boxes, bidx)


def _roi_pooler_ref(x, box_lists, pooler):
    boxes = jnp.concatenate([b.astype(jnp.float32) for b in box_lists], axis=0)
    bidx = jnp.concatenate([jnp.full((int(b.shape[0]),), i, jnp.int32)
                            for i, b in enumerate(box_lists)], axis=0)
    P, S = pooler.output_size[0], pooler.sampling_ratio
    area = (boxes[:, 2] - boxes[:, 0]) * (boxes[:, 3] - boxes[:, 1])
    lvl = jnp.floor(pooler.canonical_level +
                    jnp.log2(jnp.sqrt(area) / pooler.canonical_box_size + 1e-8))
    lvl = jnp.clip(lvl, pooler.min_level, pooler.max_level).astype(jnp.int32) - pooler.min_level
    M, C = boxes.shape[0], x[0].shape[1]
    out = jnp.zeros((M, C, P, P), x[0].dtype)
    for level, scale in enumerate(pooler.scales):
        pooled = _roi_align_ref(x[level], boxes, bidx, scale, P, S)
        out = jnp.where((lvl == level)[:, None, None, None], pooled, out)
    return out


if __name__ == "__main__":
    key = jax.random.PRNGKey(0)
    N, C = 2, 4
    img = 64
    scales = (1.0 / 4.0, 1.0 / 8.0)        # 2-level pyramid -> levels 2, 3
    output_size = 4
    sampling_ratio = 2

    k1, k2 = jax.random.split(key)
    feats = [
        jax.random.normal(k1, (N, C, img // 4, img // 4), jnp.float32),  # (2,4,16,16)
        jax.random.normal(k2, (N, C, img // 8, img // 8), jnp.float32),  # (2,4,8,8)
    ]
    # Boxes (x0, y0, x1, y1) in image coordinates; sizes chosen so both levels
    # receive some boxes with canonical_box_size=32, canonical_level=3.
    boxes_im0 = jnp.array([[4.0, 4.0, 20.0, 20.0],
                           [10.0, 8.0, 50.0, 44.0],
                           [0.0, 0.0, 30.0, 16.0]], jnp.float32)
    boxes_im1 = jnp.array([[8.0, 12.0, 24.0, 40.0],
                           [2.0, 2.0, 60.0, 60.0],
                           [16.0, 16.0, 34.0, 30.0]], jnp.float32)
    box_lists = [boxes_im0, boxes_im1]

    pooler = ROIPoolerPallas(output_size, scales, sampling_ratio,
                             canonical_box_size=32, canonical_level=3)
    out = pooler(feats, box_lists)
    out = jax.block_until_ready(out)

    assert out.shape == (6, C, output_size, output_size), out.shape

    ref = _roi_pooler_ref(feats, box_lists, pooler)
    assert jnp.all(jnp.isfinite(out))
    assert jnp.allclose(out, ref, atol=2e-2, rtol=2e-2), \
        float(jnp.max(jnp.abs(out - ref)))

    print("KERNEL_OK")
</pallas_src>

<mosaic_0001>
module attributes {stable_mosaic.version = 11 : i64} {
  func.func @_roi_align_kernel(%arg0: i32, %arg1: i32, %arg2: memref<4xi32, #tpu.memory_space<smem>>, %arg3: memref<1x4x16xf32, #tpu.memory_space<vmem>>, %arg4: memref<1x4x16xf32, #tpu.memory_space<vmem>>, %arg5: memref<1x16x16x4xf32, #tpu.memory_space<vmem>>, %arg6: memref<1x4x4x4xf32, #tpu.memory_space<vmem>>) attributes {dimension_semantics = [#tpu.dimension_semantics<parallel>, #tpu.dimension_semantics<parallel>], iteration_bounds = array<i64: 1, 4>, scalar_prefetch = 1 : i64, scratch_operands = 0 : i64, tpu.core_type = #tpu.core_type<tc>, window_params = [{transform_indices = @transform_0, window_bounds = array<i64: 1, 4, 16>}, {transform_indices = @transform_1, window_bounds = array<i64: 1, 4, 16>}, {transform_indices = @transform_2, window_bounds = array<i64: 1, 16, 16, 4>}, {transform_indices = @transform_3, window_bounds = array<i64: 1, 4, 4, 4>}]} {
    %c0 = arith.constant 0 : index
    %c0_0 = arith.constant 0 : index
    %c0_1 = arith.constant 0 : index
    %c0_2 = arith.constant 0 : index
    %0 = vector.load %arg5[%c0, %c0_0, %c0_1, %c0_2] : memref<1x16x16x4xf32, #tpu.memory_space<vmem>>, vector<1x16x16x4xf32>
    %1 = vector.shape_cast %0 : vector<1x16x16x4xf32> to vector<16x16x4xf32>
    %c0_3 = arith.constant 0 : index
    %c0_4 = arith.constant 0 : index
    %c0_5 = arith.constant 0 : index
    %2 = vector.load %arg3[%c0_3, %c0_4, %c0_5] : memref<1x4x16xf32, #tpu.memory_space<vmem>>, vector<1x4x16xf32>
    %3 = vector.shape_cast %2 : vector<1x4x16xf32> to vector<4x16xf32>
    %c0_6 = arith.constant 0 : index
    %c0_7 = arith.constant 0 : index
    %c0_8 = arith.constant 0 : index
    %4 = vector.load %arg4[%c0_6, %c0_7, %c0_8] : memref<1x4x16xf32, #tpu.memory_space<vmem>>, vector<1x4x16xf32>
    %5 = vector.shape_cast %4 : vector<1x4x16xf32> to vector<4x16xf32>
    %6 = vector.shape_cast %1 : vector<16x16x4xf32> to vector<16x64xf32>
    %cst = arith.constant dense<0.000000e+00> : vector<4x64xf32>
    %7 = tpu.matmul %3, %6, %cst {dimension_numbers = #tpu.dot_dimension_numbers<[1], [0], [0], [1], [0, 0, 1, 1], [], []>} : vector<4x16xf32>, vector<16x64xf32>, vector<4x64xf32> -> vector<4x64xf32>
    %8 = vector.shape_cast %7 : vector<4x64xf32> to vector<4x16x4xf32>
    %9 = vector.extract_strided_slice %8 {offsets = [0, 0, 0], sizes = [1, 16, 4], strides = [1, 1, 1]} : vector<4x16x4xf32> to vector<1x16x4xf32>
    %10 = vector.shape_cast %9 : vector<1x16x4xf32> to vector<16x4xf32>
    %cst_9 = arith.constant dense<0.000000e+00> : vector<4x4xf32>
    %11 = tpu.matmul %5, %10, %cst_9 {dimension_numbers = #tpu.dot_dimension_numbers<[1], [0], [0], [1], [0, 0, 1, 1], [], []>} : vector<4x16xf32>, vector<16x4xf32>, vector<4x4xf32> -> vector<4x4xf32>
    %c0_10 = arith.constant 0 : index
    %c0_11 = arith.constant 0 : index
    %c0_12 = arith.constant 0 : index
    %c0_13 = arith.constant 0 : index
    %12 = vector.load %arg6[%c0_10, %c0_11, %c0_12, %c0_13] : memref<1x4x4x4xf32, #tpu.memory_space<vmem>>, vector<1x1x4x4xf32>
    %13 = vector.shape_cast %12 : vector<1x1x4x4xf32> to vector<4x4xf32>
    %14 = vector.shape_cast %11 : vector<4x4xf32> to vector<1x1x4x4xf32>
    tpu.vector_store %arg6[%c0_10, %c0_11, %c0_12, %c0_13], %14 {strides = array<i32>} : memref<1x4x4x4xf32, #tpu.memory_space<vmem>>, vector<1x1x4x4xf32>,
    %15 = vector.extract_strided_slice %8 {offsets = [1, 0, 0], sizes = [1, 16, 4], strides = [1, 1, 1]} : vector<4x16x4xf32> to vector<1x16x4xf32>
    %16 = vector.shape_cast %15 : vector<1x16x4xf32> to vector<16x4xf32>
    %cst_14 = arith.constant dense<0.000000e+00> : vector<4x4xf32>
    %17 = tpu.matmul %5, %16, %cst_14 {dimension_numbers = #tpu.dot_dimension_numbers<[1], [0], [0], [1], [0, 0, 1, 1], [], []>} : vector<4x16xf32>, vector<16x4xf32>, vector<4x4xf32> -> vector<4x4xf32>
    %c0_15 = arith.constant 0 : index
    %c1 = arith.constant 1 : index
    %c0_16 = arith.constant 0 : index
    %c0_17 = arith.constant 0 : index
    %18 = vector.load %arg6[%c0_15, %c1, %c0_16, %c0_17] : memref<1x4x4x4xf32, #tpu.memory_space<vmem>>, vector<1x1x4x4xf32>
    %19 = vector.shape_cast %18 : vector<1x1x4x4xf32> to vector<4x4xf32>
    %20 = vector.shape_cast %17 : vector<4x4xf32> to vector<1x1x4x4xf32>
    tpu.vector_store %arg6[%c0_15, %c1, %c0_16, %c0_17], %20 {strides = array<i32>} : memref<1x4x4x4xf32, #tpu.memory_space<vmem>>, vector<1x1x4x4xf32>,
    %21 = vector.extract_strided_slice %8 {offsets = [2, 0, 0], sizes = [1, 16, 4], strides = [1, 1, 1]} : vector<4x16x4xf32> to vector<1x16x4xf32>
    %22 = vector.shape_cast %21 : vector<1x16x4xf32> to vector<16x4xf32>
    %cst_18 = arith.constant dense<0.000000e+00> : vector<4x4xf32>
    %23 = tpu.matmul %5, %22, %cst_18 {dimension_numbers = #tpu.dot_dimension_numbers<[1], [0], [0], [1], [0, 0, 1, 1], [], []>} : vector<4x16xf32>, vector<16x4xf32>, vector<4x4xf32> -> vector<4x4xf32>
    %c0_19 = arith.constant 0 : index
    %c2 = arith.constant 2 : index
    %c0_20 = arith.constant 0 : index
    %c0_21 = arith.constant 0 : index
    %24 = vector.load %arg6[%c0_19, %c2, %c0_20, %c0_21] : memref<1x4x4x4xf32, #tpu.memory_space<vmem>>, vector<1x1x4x4xf32>
    %25 = vector.shape_cast %24 : vector<1x1x4x4xf32> to vector<4x4xf32>
    %26 = vector.shape_cast %23 : vector<4x4xf32> to vector<1x1x4x4xf32>
    tpu.vector_store %arg6[%c0_19, %c2, %c0_20, %c0_21], %26 {strides = array<i32>} : memref<1x4x4x4xf32, #tpu.memory_space<vmem>>, vector<1x1x4x4xf32>,
    %27 = vector.extract_strided_slice %8 {offsets = [3, 0, 0], sizes = [1, 16, 4], strides = [1, 1, 1]} : vector<4x16x4xf32> to vector<1x16x4xf32>
    %28 = vector.shape_cast %27 : vector<1x16x4xf32> to vector<16x4xf32>
    %cst_22 = arith.constant dense<0.000000e+00> : vector<4x4xf32>
    %29 = tpu.matmul %5, %28, %cst_22 {dimension_numbers = #tpu.dot_dimension_numbers<[1], [0], [0], [1], [0, 0, 1, 1], [], []>} : vector<4x16xf32>, vector<16x4xf32>, vector<4x4xf32> -> vector<4x4xf32>
    %c0_23 = arith.constant 0 : index
    %c3 = arith.constant 3 : index
    %c0_24 = arith.constant 0 : index
    %c0_25 = arith.constant 0 : index
    %30 = vector.load %arg6[%c0_23, %c3, %c0_24, %c0_25] : memref<1x4x4x4xf32, #tpu.memory_space<vmem>>, vector<1x1x4x4xf32>
    %31 = vector.shape_cast %30 : vector<1x1x4x4xf32> to vector<4x4xf32>
    %32 = vector.shape_cast %29 : vector<4x4xf32> to vector<1x1x4x4xf32>
    tpu.vector_store %arg6[%c0_23, %c3, %c0_24, %c0_25], %32 {strides = array<i32>} : memref<1x4x4x4xf32, #tpu.memory_space<vmem>>, vector<1x1x4x4xf32>,
    return
  }
  func.func @transform_0(%arg0: i32, %arg1: i32, %arg2: memref<4xi32, #tpu.memory_space<smem>>) -> (i32, i32, i32) {
    %c0_i32 = arith.constant 0 : i32
    %c0_i32_0 = arith.constant 0 : i32
    %c0_i32_1 = arith.constant 0 : i32
    return %arg1, %c0_i32, %c0_i32_0 : i32, i32, i32
  }
  func.func @transform_1(%arg0: i32, %arg1: i32, %arg2: memref<4xi32, #tpu.memory_space<smem>>) -> (i32, i32, i32) {
    %c0_i32 = arith.constant 0 : i32
    %c0_i32_0 = arith.constant 0 : i32
    %c0_i32_1 = arith.constant 0 : i32
    return %arg1, %c0_i32, %c0_i32_0 : i32, i32, i32
  }
  func.func @transform_2(%arg0: i32, %arg1: i32, %arg2: memref<4xi32, #tpu.memory_space<smem>>) -> (i32, i32, i32, i32) {
    %0 = arith.index_cast %arg1 : i32 to index
    %1 = memref.load %arg2[%0] : memref<4xi32, #tpu.memory_space<smem>>
    %c0_i32 = arith.constant 0 : i32
    %c0_i32_0 = arith.constant 0 : i32
    %c0_i32_1 = arith.constant 0 : i32
    return %1, %c0_i32, %c0_i32_0, %arg0 : i32, i32, i32, i32
  }
  func.func @transform_3(%arg0: i32, %arg1: i32, %arg2: memref<4xi32, #tpu.memory_space<smem>>) -> (i32, i32, i32, i32) {
    %c0_i32 = arith.constant 0 : i32
    %c0_i32_0 = arith.constant 0 : i32
    %c0_i32_1 = arith.constant 0 : i32
    return %arg1, %c0_i32, %c0_i32_0, %arg0 : i32, i32, i32, i32
  }
}

</mosaic_0001>

<bundles_post_ra>
// kernel: tpu_custom_call.1
= control target key start
LH: loop header
LB: loop body
LE: loop exit
PB: predicated region body
PF: predicated region fallthrough
CT: control target
= control target key end

     0   :  { %s2916_s0 = inlined_call_operand.hbm [shape: s32[4], index: 0, kind: input, shape index: {}]   ;;  %s2917_s1 = inlined_call_operand.hbm [shape: f32[4,4,16], index: 1, kind: input, shape index: {}]   ;;  %s2918_s2 = inlined_call_operand.hbm [shape: f32[4,4,16], index: 2, kind: input, shape index: {}]   ;;  %s2919_s3 = inlined_call_operand.hbm [shape: f32[2,16,16,4], index: 3, kind: input, shape index: {}]   ;;  %s2920_s4 = inlined_call_operand.hbm [shape: f32[4,4,4,4], index: 4, kind: output, shape index: {}]  }
   0x1   :  { %2932 = sst [smem:[#allocation23_spill]] %s2918_s2  ;;  %s2028_s17 = scalar_lea.hbm %s2916_s0, 16 }
   0x2   :  { %2933 = sst [smem:[#allocation24_spill]] %s2920_s4  ;;  %p2029_p0 = scmp.ne.s32.totalorder %s2916_s0, %s2028_s17 }
   0x3   :  { %p2032_p1 = scmp.lt.u32.totalorder %s2028_s17, %s2916_s0 }
   0x5   :  { %p2034_p2 = pnand %p2032_p1, %p2029_p0 }
   0x7   :  { %2037 = shalt.err (!%p2034_p2)  }
   0x8   :  { %s2246_s22 = smov [#allocation3]  }
   0x9   :  { %10 = dma.hbm_to_smem %s2916_s0, 16, %s2246_s22, [#allocation2] }
   0xa   :  { %2192 = dma.done.wait [#allocation2], 16 }
   0xb   :  { %2193 = vsyncadd [#allocation2], 4294967280 }
   0xc   :  { %12 = sfence }
   0xd   :  { %13 = vsyncpa [#allocation5], 0 }
   0xe   :  { %15 = vsyncpa [#allocation5 + $0x1], 0 }
   0xf   :  { %16 = vsyncpa [#allocation8], 0 }
  0x10   :  { %18 = vsyncpa [#allocation8 + $0x1], 0 }
  0x11   :  { %19 = vsyncpa [#allocation6], 0 }
  0x12   :  { %21 = vsyncpa [#allocation6 + $0x1], 0  ;;  %s2326_s25 = smov 0   ;;  %s2328_s26 = smov 0  }
  0x13   :  { %s2330_s27 = smov 0   ;;  %s2332_s28 = smov 0  }
  0x14   :  { %s2334_s29 = smov 0   ;;  %s2336_s0 = smov 0  }
  0x15   :  { %s2338_s30 = smov 0   ;;  %s2340_s5 = smov 0  }
  0x16   :  { %s2342_s6 = smov 0  }
  0x17 LB: > { %2934 = sst [smem:[#allocation18_spill]] %s2224_s28  ;;  %s2372_s7 = sadd.s32 4294967295, %s2244_s6   ;;  %s2244_s6 = sphi %s2342_s6, %s27_s6   ;;  %s2240_s5 = sphi %s2340_s5, %s2973_s5   ;;  %s2236_s30 = sphi %s2338_s30, %s2972_s30   ;;  %s2232_s0 = sphi %s2336_s0, %s2971_s0   ;;  %s2228_s29 = sphi %s2334_s29, %s2970_s29   ;;  %s2224_s28 = sphi %s2332_s28, %s2969_s28   ;;  %s2220_s27 = sphi %s2330_s27, %s2968_s27   ;;  %s2216_s26 = sphi %s2328_s26, %s2967_s26   ;;  %s2212_s25 = sphi %s2326_s25, %s2966_s25  }
  0x18   : > { %s1719_s8 = sadd.s32 4294967294, %s2244_s6   ;;  %s36_s9 = sadd.s32 1, %s2240_s5 }
  0x19   : > { %s46_s10 = sadd.s32 1, %s2232_s0  ;;  %p37_p3 = scmp.ge.s32.totalorder %s36_s9, 4 }
  0x1a   : > { %p53_p4 = scmp.ne.s32.totalorder %s2232_s0, %s2228_s29  ;;  %p54_p5 = scmp.eq.s32.totalorder %s2244_s6, 0 }
  0x1b   : > { %p59_p6 = scmp.ne.s32.totalorder %s2228_s29, %s2224_s28  ;;  %s2975_s9 = smov (%p37_p3, %s36_s9), 0 }
  0x1c   : > { %2935 = sst [smem:[#allocation19_spill]] %s2975_s9  ;;  %p2389_p7 = por %p54_p5, %p53_p4 }
  0x1d   : > { %p60_p8 = scmp.eq.s32.totalorder %s2372_s7, 0  ;;  %s43_s12 = ssub.s32 %s2240_s5, %s2975_s9 }
  0x1e   : > { %s95_s13 = sld [smem:[#allocation3 + %s2240_s5]]  ;;  %p44_p9 = scmp.eq.s32.totalorder %s43_s12, 0 }
  0x1f   : > { %p2402_p10 = por %p60_p8, %p59_p6  ;;  %s96_s15 = sld [smem:[#allocation3 + %s2975_s9]] }
  0x20   : > { %s102_s16 = sadd.s32 1, %s2220_s27  ;;  %p109_p11 = scmp.ne.s32.totalorder %s2220_s27, %s2216_s26 }
  0x21   : > { %s2937_s14 = scalar_select %p2402_p10, 1, 0 }
  0x22   : > { %s2409_s17 = scalar_select %p44_p9, %s2232_s0, %s46_s10  }
  0x23   : > { %p115_p12 = scmp.ne.s32.totalorder %s2216_s26, %s2212_s25  ;;  %p141_p13 = scmp.eq.s32.totalorder %s2372_s7, 3 }
  0x24   : > { %2938 = sst [smem:[#allocation20_spill]] %s2409_s17  ;;  %p147_p0 = scmp.eq.s32.totalorder %s1719_s8, 3 }
  0x25   : > { %p2418_p1 = por %p109_p11, %p54_p5  ;;  %p2424_p2 = por %p115_p12, %p60_p8 }
  0x26   : > { %p2431_p3 = por %p141_p13, %p53_p4  ;;  %p2438_p9 = por %p147_p0, %p59_p6 }
  0x27   : > { %s2940_s19 = scalar_select %p2424_p2, 1, 0 }
  0x28   : > { %s2941_s20 = scalar_select %p2431_p3, 1, 0 }
  0x29   : > { %s2942_s21 = scalar_select %p2438_p9, 1, 0 }
  0x2a   : > { %s97_s22 = ssub.s32 %s95_s13, %s96_s15  ;;  %p2924_p11 = scmp.lt.s32.totalorder %s2244_s6, 4 }
  0x2b   : > { %2943 = sst [smem:[#allocation21_spill]] %s2942_s21  ;;  %p100_p5 = scmp.eq.s32.totalorder %s97_s22, 0 }
  0x2c   : > { %s2921_s23 = sand.u32 1, %s2232_s0   ;;  %s2923_s24 = sshll.u32 %s2240_s5, 6 }
  0x2d   : > { %s2446_s25 = scalar_select %p100_p5, %s2220_s27, %s102_s16  }
  0x2e   : > { %s2450_s8 = sshll.u32 %s2921_s23, 2  ;;  %p2456_p4 = pnand %p2924_p11, %p2389_p7 }
  0x2f   : > { %2944 = sst [smem:[#allocation22_spill]] %s2446_s25  ;;  %s185_s12 = sand.u32 1, %s2244_s6  }
  0x30   : > { %s2946_s2 = sld [smem:[#allocation23_spill]]  ;;  %s189_s11 = scalar_lea.vmem [#allocation7], %s2450_s8 }
  0x31   : > { %s196_s16 = sshll.u32 %s189_s11, 4  ;;  %p2475_p6 = pnand %p2924_p11, %p2418_p1  ;;  %s2469_s16 = int_to_ptr.vmem [resolvable:$true] %s196_s16 }
  0x32   : > { %s2479_s9 = scalar_lea.sflag [#allocation8], %s185_s12  ;;  %p2040_p8 = pneg %p2456_p4 }
  0x33   : > { %s2947_s23 = scalar_select %p2475_p6, 1, 0 }
  0x36   : > { %s2466_s22 = scalar_lea.hbm %s2946_s2, %s2923_s24  ;;  %s2043_s11 = scalar_lea.hbm %s2946_s2, 256 }
  0x37   : > { %s2038_s17 = scalar_lea.hbm %s2466_s22, 64  ;;  %p2044_p0 = scmp.lt.u32.totalorder %s2466_s22, %s2946_s2 }
  0x38   : > { %p2039_p7 = scmp.ne.s32.totalorder %s2466_s22, %s2038_s17  ;;  %p2045_p5 = scmp.lt.u32.totalorder %s2043_s11, %s2038_s17 }
  0x39   : > { %p2047_p9 = scmp.lt.u32.totalorder %s2038_s17, %s2466_s22 }
  0x3a   : > { %p2041_p12 = pnand %p2040_p8, %p2039_p7  ;;  %p2046_p11 = por %p2045_p5, %p2044_p0 }
  0x3c   : > { %p2042_p13 = pneg %p2041_p12  ;;  %p2048_p3 = por %p2047_p9, %p2046_p11 }
  0x3e   : > { %p2049_p2 = pnand %p2048_p3, %p2042_p13 }
  0x40   : > { %2052 = shalt.err (!%p2049_p2)
}
  0x41   : > { %s2053_s12 = scalar_lea.vmem %s2469_s16, 64  ;;  %s2247_s13 = smov [#allocation7]  }
  0x42   : > { %p2054_p7 = scmp.ne.s32.totalorder %s2469_s16, %s2053_s12  ;;  %s2058_s15 = sshll.u32 %s2247_s13, 4  ;;  %s2059_s15 = int_to_ptr.vmem [resolvable:$false] %s2058_s15 }
  0x43   : > { %s2060_s24 = scalar_lea.vmem %s2059_s15, 128  ;;  %p2061_p6 = scmp.lt.s32.totalorder %s2469_s16, %s2059_s15 }
  0x44   : > { %p2056_p12 = pnand %p2054_p7, %p2040_p8  ;;  %p2062_p0 = scmp.lt.s32.totalorder %s2060_s24, %s2053_s12 }
  0x46   : > { %p2057_p10 = pneg %p2056_p12  ;;  %p2063_p5 = por %p2062_p0, %p2061_p6 }
  0x48   : > { %p2064_p9 = pnand %p2063_p5, %p2057_p10 }
  0x4a   : > { %2067 = shalt.err (!%p2064_p9)
}
  0x4b   : > { %1830 = dma.hbm_to_vmem [thread:$0]  (!%p2456_p4), %s2466_s22, 64, %s2469_s16, %s2479_s9  }
  0x4c   : > { %p1729_p2 = scmp.ge.s32.totalorder %s2244_s6, 1  ;;  %p224_p10 = scmp.lt.s32.totalorder %s2244_s6, 5 }
  0x4d   : > { %s2949_s11 = sshll.u32 %s2240_s5, 6  ;;  %s171_s24 = scalar_lea.vmem [#allocation4], %s2450_s8 }
  0x4e   : > { %p2512_p3 = pnand %p1729_p2, %p224_p10  ;;  %s2521_s15 = scalar_lea.hbm %s2917_s1, %s2949_s11 }
  0x4f   : > { %s178_s22 = sshll.u32 %s171_s24, 4  ;;  %s205_s16 = sand.u32 1, %s2220_s27   ;;  %s2524_s22 = int_to_ptr.vmem [resolvable:$true] %s178_s22 }
  0x50   : > { %s2948_s25 = scalar_select %p2512_p3, 1, 0 }
  0x51   : > { %s2950_s17 = sand.u32 1, %s2232_s0   ;;  %s2068_s21 = scalar_lea.hbm %s2521_s15, 64 }
  0x52   : > { %s168_s2 = scalar_lea.sflag [#allocation5], %s2950_s17  ;;  %p2069_p11 = scmp.ne.s32.totalorder %s2521_s15, %s2068_s21 }
  0x53   : > { %s2073_s13 = scalar_lea.hbm %s2917_s1, 256  ;;  %p2074_p7 = scmp.lt.u32.totalorder %s2521_s15, %s2917_s1 }
  0x54   : > { %p2071_p6 = pnand %p2069_p11, %p2040_p8  ;;  %p2075_p12 = scmp.lt.u32.totalorder %s2073_s13, %s2068_s21 }
  0x55   : > { %p2077_p5 = scmp.lt.u32.totalorder %s2068_s21, %s2521_s15 }
  0x56   : > { %p2072_p13 = pneg %p2071_p6  ;;  %p2076_p0 = por %p2075_p12, %p2074_p7 }
  0x58   : > { %p2078_p9 = por %p2077_p5, %p2076_p0 }
  0x5a   : > { %p2079_p2 = pnand %p2078_p9, %p2072_p13 }
  0x5c   : > { %2082 = shalt.err (!%p2079_p2)
}
  0x5d   : > { %s2083_s8 = scalar_lea.vmem %s2524_s22, 64  ;;  %s2248_s17 = smov [#allocation4]  }
  0x5e   : > { %p2084_p10 = scmp.ne.s32.totalorder %s2524_s22, %s2083_s8  ;;  %s2088_s24 = sshll.u32 %s2248_s17, 4  ;;  %s2089_s24 = int_to_ptr.vmem [resolvable:$false] %s2088_s24 }
  0x5f   : > { %s2090_s4 = scalar_lea.vmem %s2089_s24, 128  ;;  %p2091_p3 = scmp.lt.s32.totalorder %s2524_s22, %s2089_s24 }
  0x60   : > { %p2086_p11 = pnand %p2084_p10, %p2040_p8  ;;  %p2092_p7 = scmp.lt.s32.totalorder %s2090_s4, %s2083_s8 }
  0x62   : > { %p2087_p6 = pneg %p2086_p11  ;;  %p2093_p12 = por %p2092_p7, %p2091_p3 }
  0x64   : > { %p2094_p0 = pnand %p2093_p12, %p2087_p6 }
  0x66   : > { %2097 = shalt.err (!%p2094_p0)
}
  0x67   : > { %1827 = dma.hbm_to_vmem [thread:$0]  (!%p2456_p4), %s2521_s15, 64, %s2524_s22, %s168_s2  }
  0x68   : > { %s1726_s28 = sshll.u32 %s205_s16, 8  ;;  %p2952_p8 = scmp.lt.s32.totalorder %s2244_s6, 4 }
  0x69   : > { %s1816_s21 = scalar_select %p2418_p1, [#allocation3], [#allocation11] }
  0x6a   : > { %s2951_s12 = scalar_select %p2418_p1, %s2240_s5, 0 }
  0x6b   : > { %p2953_p3 = pmov %p2952_p8  ;;  %s207_s11 = scalar_lea.vmem [#allocation9], %s1726_s28 }
  0x6c   : > { %s2977_s12 = smov (!%p2952_p8, %s2951_s12), 0  ;;  %s216_s13 = sshll.u32 %s207_s11, 4  ;;  %s2564_s13 = int_to_ptr.vmem [resolvable:$true] %s216_s13 }
  0x6d   : > { %s2979_s21 = smov (!%p2953_p3, %s1816_s21), [#allocation12]  ;;  %p2954_p4 = scmp.ne.s32.totalorder %s2947_s23, 0 }
  0x6e   : > { %s208_s10 = sld [smem:[%s2979_s21 + %s2977_s12]]  ;;  %s2103_s16 = scalar_lea.hbm %s2919_s3, 8192 }
  0x6f   : > { %p2100_p13 = pneg %p2954_p4 }
  0x74   : > { %s1747_s8 = sshll.u32 %s208_s10, 12 }
  0x75   : > { %s2569_s2 = scalar_lea.hbm %s2919_s3, %s1747_s8 }
  0x76   : > { %s2098_s18 = scalar_lea.hbm %s2569_s2, 4096  ;;  %p2104_p2 = scmp.lt.u32.totalorder %s2569_s2, %s2919_s3 }
  0x77   : > { %p2099_p1 = scmp.ne.s32.totalorder %s2569_s2, %s2098_s18  ;;  %p2105_p10 = scmp.lt.u32.totalorder %s2103_s16, %s2098_s18 }
  0x78   : > { %p2107_p6 = scmp.lt.u32.totalorder %s2098_s18, %s2569_s2 }
  0x79   : > { %p2101_p5 = pnand %p2100_p13, %p2099_p1  ;;  %p2106_p11 = por %p2105_p10, %p2104_p2 }
  0x7b   : > { %p2102_p9 = pneg %p2101_p5  ;;  %p2108_p7 = por %p2107_p6, %p2106_p11 }
  0x7d   : > { %p2109_p12 = pnand %p2108_p7, %p2102_p9 }
  0x7f   : > { %2112 = shalt.err (!%p2109_p12)
}
  0x80   : > { %s2113_s21 = scalar_lea.vmem %s2564_s13, 4096  ;;  %s2249_s12 = smov [#allocation9]  }
  0x81   : > { %p2114_p0 = scmp.ne.s32.totalorder %s2564_s13, %s2113_s21  ;;  %s2118_s10 = sshll.u32 %s2249_s12, 4  ;;  %s2119_s10 = int_to_ptr.vmem [resolvable:$false] %s2118_s10 }
  0x82   : > { %s2120_s11 = scalar_lea.vmem %s2119_s10, 8192  ;;  %p2121_p1 = scmp.lt.s32.totalorder %s2564_s13, %s2119_s10 }
  0x83   : > { %p2116_p8 = pnand %p2114_p0, %p2100_p13  ;;  %p2122_p5 = scmp.lt.s32.totalorder %s2120_s11, %s2113_s21 }
  0x85   : > { %p2117_p3 = pneg %p2116_p8  ;;  %p2123_p2 = por %p2122_p5, %p2121_p1 }
  0x87   : > { %p2124_p10 = pnand %p2123_p2, %p2117_p3 }
  0x89   : > { %2127 = shalt.err (!%p2124_p10)
}
  0x8a   : > { %s2250_s8 = smov 128   ;;  %s2251_s17 = smov 8  }
  0x8b   : > { %1835 = dma.hbm_to_vmem [thread:$0]  (!%p2954_p4), %s2569_s2, 4096, %s2564_s13, %s2479_s9, %s2250_s8, %s2250_s8, %s2251_s17  }
  0x8c   : > { %p2955_p13 = scmp.ne.s32.totalorder %s2948_s25, 0 }
  0x8d   : > { %s2600_s24 = sand.u32 (!%p2955_p13), 1, %s2228_s29   ;;  %p2956_p9 = scmp.ne.s32.totalorder (!%p2955_p13), %s2937_s14, 0 }
  0x8e   : > { %228 = sbr.rel (%p2955_p13) target bundleno = 939 (0x3ab), region = 32  ;;  %s1730_s18 = sshll.u32 (!%p2955_p13), %s2600_s24, 2 }
  0x8f   : > { %s231_s15 = scalar_lea.sflag (!%p2955_p13), [#allocation5], %s2600_s24  ;;  %s2604_s22 = scalar_lea.vmem (!%p2955_p13), [#allocation4], %s1730_s18 }
  0x95   : > { %2195 = dma.done.wait (%p2956_p9), %s231_s15, 64  }
  0x96   : > { %2197 = vsyncadd (%p2956_p9), %s231_s15, 4294967232  ;;  %s239_s9 = sand.u32 1, %s2372_s7   ;;  %s2611_s25 = scalar_lea.vmem [#allocation7], %s1730_s18 }
  0x97   : > { %s240_s23 = scalar_lea.sflag [#allocation8], %s239_s9 }
  0x98   : > { %2199 = dma.done.wait (%p2956_p9), %s240_s23, 64  }
  0x99   : > { %2201 = vsyncadd (%p2956_p9), %s240_s23, 4294967232  ;;  %s250_s13 = sand.u32 1, %s2216_s26   ;;  %p2957_p4 = scmp.ne.s32.totalorder %s2940_s19, 0 }
  0x9a   : > { %s1732_s2 = sshll.u32 %s250_s13, 8 }
  0x9b   : > { %s2618_s16 = scalar_lea.vmem [#allocation9], %s1732_s2 }
  0x9c   : > { %2203 = dma.done.wait (%p2957_p4), %s240_s23, 4096  }
  0x9d   : > { %2205 = vsyncadd (%p2957_p4), %s240_s23, 4294963200  ;;  %v325_v0 = vlaneseq  ;;  %v2252_v1 = vmov 1983009808   ;;  %v2253_v3 = vmov 1934713408   ;;  %v286_v9 = vld [vmem:[%s2618_s16] sm:$0xff] }
  0x9e   : > { %v323_v2 = vunpack.c.l.s4 %v2252_v1  ;;  %v387_v4 = vunpack.c.l.s4 %v2253_v3  ;;  %v288_v10 = vld [vmem:[%s2618_s16 + $0x10] sm:$0xff]  ;;  %v290_v11 = vld [vmem:[%s2618_s16 + $0x20] sm:$0xff]  ;;  %s2254_s7 = smov 4   ;;  %s2255_s14 = smov 12   ;;  %vm2268_vm0 = vmmov 0   ;;  %vm984_vm1 = vcmask 31744  }
  0x9f   : > { %v326_v5 = vshrl.u32 %v325_v0, 7  ;;  %v292_v12 = vld [vmem:[%s2618_s16 + $0x30] sm:$0xff]  ;;  %v294_v13 = vld [vmem:[%s2618_s16 + $0x40] sm:$0xff]  ;;  %v320_v15 = vcombine.low %v286_v9, %v290_v11  ;;  %v321_v19 = vcombine.high %v286_v9, %v290_v11  ;;  %s2256_s19 = smov 8   ;;  %s2257_s4 = smov 16   ;;  %vm987_vm2 = vcmask 64512  }
  0xa0   : > { %v324_v6 = vunpack.c.0.s8 %v323_v2  ;;  %v388_v7 = vunpack.c.0.s8 %v387_v4  ;;  %v296_v14 = vld [vmem:[%s2618_s16 + $0x50] sm:$0xff]  ;;  %v298_v16 = vld [vmem:[%s2618_s16 + $0x60] sm:$0xff]  ;;  %v336_v20 = vcombine.low %v288_v10, %v292_v12  ;;  %v337_v21 = vcombine.high %v288_v10, %v292_v12  ;;  %s2258_s28 = smov 20   ;;  %s2259_s21 = smov 24  }
  0xa1   : > { %v300_v17 = vld [vmem:[%s2618_s16 + $0x70] sm:$0xff]  ;;  %v302_v18 = vld [vmem:[%s2618_s16 + $0x80] sm:$0xff]  ;;  %v352_v27 = vcombine.low %v294_v13, %v298_v16  ;;  %v353_v28 = vcombine.high %v294_v13, %v298_v16  ;;  %s2260_s12 = smov 28   ;;  %s2261_s10 = smov 32   ;;  %vm990_vm3 = vcmask 97280   ;;  %vm993_vm4 = vcmask 130048  }
  0xa2   : > { %v2624_v8 = vsub.s32 %v324_v6, %v326_v5  ;;  %v2635_v22 = vsub.s32 %v388_v7, %v326_v5  ;;  %v304_v23 = vld [vmem:[%s2618_s16 + $0x90] sm:$0xff]  ;;  %v306_v24 = vld [vmem:[%s2618_s16 + $0xa0] sm:$0xff]  ;;  %v368_v29 = vcombine.low %v296_v14, %v300_v17  ;;  %v369_v34 = vcombine.high %v296_v14, %v300_v17  ;;  %s2262_s11 = smov 36   ;;  %s2263_s8 = smov 40  }
  0xa3   : > { %v308_v25 = vld [vmem:[%s2618_s16 + $0xb0] sm:$0xff]  ;;  %v310_v30 = vld [vmem:[%s2618_s16 + $0xc0] sm:$0xff]  ;;  %v456_v35 = vcombine.low %v302_v18, %v306_v24  ;;  %v457_v36 = vcombine.high %v302_v18, %v306_v24  ;;  %s2264_s17 = smov 44   ;;  %s2266_s18 = smov 48   ;;  %vm996_vm5 = vcmask 162816   ;;  %vm999_vm6 = vcmask 195584  }
  0xa4   : > { %v328_v26 = vrot.slane %v320_v15, %v2624_v8  ;;  %v312_v31 = vld [vmem:[%s2618_s16 + $0xd0] sm:$0xff]  ;;  %v314_v32 = vld [vmem:[%s2618_s16 + $0xe0] sm:$0xff]  ;;  %v344_v33 = vrot.slane %v336_v20, %v2624_v8  ;;  %v360_v38 = vrot.slane %v352_v27, %v2624_v8  ;;  %v376_v39 = vrot.slane %v368_v29, %v2624_v8  ;;  %v2690_v29 = vld [vmem:[%s2618_s16 + $0x18] sm:$0xff]  ;;  %s2267_s15 = smov 52   ;;  %s2270_s9 = smov 56  }
  0xa5   : > { %v316_v37 = vld [vmem:[%s2618_s16 + $0xf0] sm:$0xff]  ;;  %v472_v40 = vcombine.low %v304_v23, %v308_v25  ;;  %v473_v41 = vcombine.high %v304_v23, %v308_v25  ;;  %v464_v43 = vrot.slane %v456_v35, %v2624_v8  ;;  %v488_v44 = vcombine.low %v310_v30, %v314_v32  ;;  %v2697_v35 = vld [vmem:[%s2618_s16 + $0x38] sm:$0xff]  ;;  %s2271_s23 = smov 60   ;;  %s2272_s13 = smov 120  }
  0xa6   : > { %v384_v42 = vcombine.low %v328_v26, %v344_v33  ;;  %v489_v45 = vcombine.high %v310_v30, %v314_v32  ;;  %v416_v46 = vcombine.low %v360_v38, %v376_v39  ;;  %v504_v48 = vcombine.low %v312_v31, %v316_v37  ;;  %v2693_v30 = vld [vmem:[%s2618_s16 + $0x28] sm:$0xff]  ;;  %s2273_s2 = smov 124   ;;  %p2959_p6 = scmp.ne.s32.totalorder %s2941_s20, 0 }
  0xa7   : > { %v480_v47 = vrot.slane %v472_v40, %v2624_v8  ;;  %v505_v49 = vcombine.high %v312_v31, %v316_v37  ;;  %v496_v51 = vrot.slane %v488_v44, %v2624_v8  ;;  %v385_v52 = vcombine.high %v328_v26, %v344_v33  ;;  %v2703_v37 = vld [vmem:[%s2618_s16 + $0x68] sm:$0xff] }
  0xa8   : > { %v2651_v50 = vrot.slane %v384_v42, %v2635_v22  ;;  %v417_v53 = vcombine.high %v360_v38, %v376_v39  ;;  %v2655_v54 = vrot.slane %v416_v46, %v2635_v22  ;;  %v512_v55 = vrot.slane %v504_v48, %v2624_v8  ;;  %v2713_v46 = vld [vmem:[%s2618_s16 + $0x78] sm:$0xff] }
  0xa9   : > { %v520_v56 = vcombine.low %v464_v43, %v480_v47  ;;  %v521_v57 = vcombine.high %v464_v43, %v480_v47  ;;  %v399_v58 = vrot.slane %v385_v52, %v2635_v22  ;;  %v335_v60 = vrot.slane %v321_v19, %v2624_v8  ;;  %v2721_v52 = vld [vmem:[%s2618_s16 + $0x98] sm:$0xff] }
  0xaa   : > { %v431_v59 = vrot.slane %v417_v53, %v2635_v22  ;;  %v351_v61 = vrot.slane %v337_v21, %v2624_v8  ;;  %v449_v62 = vcombine.high %v2651_v50, %v2655_v54  ;;  %v552_v0 = vcombine.low %v496_v51, %v512_v55 }
  0xab   : > { %v2665_v63 = vrot.slane %v520_v56, %v2635_v22  ;;  %v448_v1 = vcombine.low %v2651_v50, %v2655_v54  ;;  %v535_v3 = vrot.slane %v521_v57, %v2635_v22  ;;  %v553_v4 = vcombine.high %v496_v51, %v512_v55  ;;  %v2718_v51 = vld [vmem:[%s2618_s16 + $0x88] sm:$0xff] }
  0xac   : > { %v451_v2 = vcombine.high %v399_v58, %v431_v59  ;;  %v450_v5 = vcombine.low %v399_v58, %v431_v59  ;;  %v2671_v6 = vrot.slane %v552_v0, %v2635_v22  ;;  %v367_v7 = vrot.slane %v353_v28, %v2624_v8  ;;  %v2687_v28 = vld [vmem:[%s2618_s16 + $0x8] sm:$0xff]  ;;  %v2739_v0 = vld [vmem:[%s2618_s16 + $0xd8] sm:$0xff] }
  0xad   : > { %v383_v9 = vrot.slane %v369_v34, %v2624_v8  ;;  %v400_v10 = vcombine.low %v335_v60, %v351_v61  ;;  %v567_v11 = vrot.slane %v553_v4, %v2635_v22  ;;  %v471_v12 = vrot.slane %v457_v36, %v2624_v8  ;;  %v2700_v36 = vld [vmem:[%s2618_s16 + $0x48] sm:$0xff] }
  0xae   : > { %v487_v13 = vrot.slane %v473_v41, %v2624_v8  ;;  %v503_v14 = vrot.slane %v489_v45, %v2624_v8  ;;  %v584_v15 = vcombine.low %v2665_v63, %v2671_v6  ;;  %v585_v16 = vcombine.high %v2665_v63, %v2671_v6  ;;  %v2710_v45 = vld [vmem:[%s2618_s16 + $0x58] sm:$0xff] }
  0xaf   : > { %v408_v17 = vrot.slane %v400_v10, %v2635_v22  ;;  %v432_v18 = vcombine.low %v367_v7, %v383_v9  ;;  %v587_v19 = vcombine.high %v535_v3, %v567_v11  ;;  %v586_v20 = vcombine.low %v535_v3, %v567_v11  ;;  %v2745_v3 = vld [vmem:[%s2618_s16 + $0xf8] sm:$0xff] }
  0xb0   : > { %v519_v21 = vrot.slane %v505_v49, %v2624_v8  ;;  %v536_v23 = vcombine.low %v471_v12, %v487_v13  ;;  %v1953_v24 = vpack.i.bf16 %v585_v16, %v449_v62  ;;  %v401_v26 = vcombine.high %v335_v60, %v351_v61  ;;  %v2730_v60 = vld [vmem:[%s2618_s16 + $0xa8] sm:$0xff]  ;;  %v2733_v61 = vld [vmem:[%s2618_s16 + $0xb8] sm:$0xff] }
  0xb1   : > { %v440_v25 = vrot.slane %v432_v18, %v2635_v22  ;;  %v433_v27 = vcombine.high %v367_v7, %v383_v9  ;;  %v1963_v31 = vpack.i.bf16 %v587_v19, %v451_v2  ;;  %v1958_v32 = vpack.i.bf16 %v586_v20, %v450_v5  ;;  %v2736_v62 = vld [vmem:[%s2618_s16 + $0xc8] sm:$0xff] }
  0xb2   : > { %v544_v33 = vrot.slane %v536_v23, %v2635_v22  ;;  %v568_v34 = vcombine.low %v503_v14, %v519_v21  ;;  %1954 = vrot.lane.b32.xlu0 %v1953_v24, %s2254_s7  ;;  %v415_v40 = vrot.slane %v401_v26, %v2635_v22  ;;  %v537_v43 = vcombine.high %v471_v12, %v487_v13  ;;  %v2742_v2 = vld [vmem:[%s2618_s16 + $0xe8] sm:$0xff]  ;;  %s2274_s16 = smov 112  }
  0xb3   : > { %v452_v38 = vcombine.low %v408_v17, %v440_v25  ;;  %v453_v39 = vcombine.high %v408_v17, %v440_v25  ;;  %v447_v41 = vrot.slane %v433_v27, %v2635_v22  ;;  %1964 = vrot.lane.b32.xlu1 %v1963_v31, %s2255_s14  ;;  %v569_v44 = vcombine.high %v503_v14, %v519_v21  ;;  %s2275_s14 = smov 116  }
  0xb4   : > { %v576_v42 = vrot.slane %v568_v34, %v2635_v22  ;;  %v592_v47 = vcombine.low %v2687_v28, %v2693_v30  ;;  %v608_v53 = vcombine.low %v2690_v29, %v2697_v35  ;;  %v624_v55 = vcombine.low %v2700_v36, %v2703_v37 }
  0xb5   : > { %v454_v48 = vcombine.low %v415_v40, %v447_v41  ;;  %v455_v49 = vcombine.high %v415_v40, %v447_v41  ;;  %v551_v58 = vrot.slane %v537_v43, %v2635_v22  ;;  %v583_v59 = vrot.slane %v569_v44, %v2635_v22 }
  0xb6   : > { %v588_v56 = vcombine.low %v544_v33, %v576_v42  ;;  %v589_v57 = vcombine.high %v544_v33, %v576_v42  ;;  %1959 = vrot.lane.b32.xlu0 %v1958_v32, %s2256_s19  ;;  %v600_v4 = vrot.slane %v592_v47, %v2624_v8  ;;  %v616_v5 = vrot.slane %v608_v53, %v2624_v8  ;;  %s2276_s19 = smov 104  }
  0xb7   : > { %v632_v7 = vrot.slane %v624_v55, %v2624_v8  ;;  %v640_v9 = vcombine.low %v2710_v45, %v2713_v46  ;;  %v590_v12 = vcombine.low %v551_v58, %v583_v59  ;;  %v591_v13 = vcombine.high %v551_v58, %v583_v59 }
  0xb8   : > { %v1968_v10 = vpack.i.bf16 %v588_v56, %v452_v38  ;;  %v1973_v11 = vpack.i.bf16 %v589_v57, %v453_v39  ;;  %v656_v16 = vcombine.low %v600_v4, %v616_v5  ;;  %v728_v17 = vcombine.low %v2718_v51, %v2730_v60 }
  0xb9   : > { %v648_v14 = vrot.slane %v640_v9, %v2624_v8  ;;  %v744_v18 = vcombine.low %v2721_v52, %v2733_v61  ;;  %v1978_v19 = vpack.i.bf16 %v590_v12, %v454_v48  ;;  %v1983_v20 = vpack.i.bf16 %v591_v13, %v455_v49 }
  0xba   : > { %1969 = vrot.lane.b32.xlu1 %v1968_v10, %s2257_s4  ;;  %v760_v21 = vcombine.low %v2736_v62, %v2742_v2  ;;  %v776_v23 = vcombine.low %v2739_v0, %v2745_v3  ;;  %1974 = vrot.lane.b32.xlu0 %v1973_v11, %s2258_s28  ;;  %v664_v24 = vrot.slane %v656_v16, %v2635_v22  ;;  %vm1002_vm7 = vcmask 228352   ;;  %s2278_s4 = smov 96   ;;  %s2279_s28 = smov 100  }
  0xbb   : > { %v688_v25 = vcombine.low %v632_v7, %v648_v14  ;;  %v736_v26 = vrot.slane %v728_v17, %v2624_v8  ;;  %v752_v27 = vrot.slane %v744_v18, %v2624_v8  ;;  %v657_v33 = vcombine.high %v600_v4, %v616_v5 }
  0xbc   : > { %v768_v31 = vrot.slane %v760_v21, %v2624_v8  ;;  %v784_v32 = vrot.slane %v776_v23, %v2624_v8  ;;  %v689_v34 = vcombine.high %v632_v7, %v648_v14  ;;  %v593_v41 = vcombine.high %v2687_v28, %v2693_v30 }
  0xbd   : > { %v696_v38 = vrot.slane %v688_v25, %v2635_v22  ;;  %v792_v39 = vcombine.low %v736_v26, %v752_v27  ;;  %v793_v40 = vcombine.high %v736_v26, %v752_v27  ;;  %v671_v43 = vrot.slane %v657_v33, %v2635_v22 }
  0xbe   : > { %1979 = vrot.lane.b32.xlu1 %v1978_v19, %s2259_s21  ;;  %v824_v42 = vcombine.low %v768_v31, %v784_v32  ;;  %v703_v44 = vrot.slane %v689_v34, %v2635_v22  ;;  %v825_v47 = vcombine.high %v768_v31, %v784_v32  ;;  %1984 = vrot.lane.b32.xlu0 %v1983_v20, %s2260_s12  ;;  %vm1005_vm8 = vcmask 261120   ;;  %s2280_s21 = smov 88   ;;  %s2281_s12 = smov 92  }
  0xbf   : > { %v720_v48 = vcombine.low %v664_v24, %v696_v38  ;;  %v800_v49 = vrot.slane %v792_v39, %v2635_v22  ;;  %v721_v53 = vcombine.high %v664_v24, %v696_v38  ;;  %v807_v55 = vrot.slane %v793_v40, %v2635_v22 }
  0xc0   : > { %v832_v56 = vrot.slane %v824_v42, %v2635_v22  ;;  %v722_v57 = vcombine.low %v671_v43, %v703_v44  ;;  %v839_v28 = vrot.slane %v825_v47, %v2635_v22  ;;  %v723_v30 = vcombine.high %v671_v43, %v703_v44 }
  0xc1   : > { %v607_v58 = vrot.slane %v593_v41, %v2624_v8  ;;  %v609_v59 = vcombine.high %v2690_v29, %v2697_v35  ;;  %v625_v4 = vcombine.high %v2700_v36, %v2703_v37  ;;  %v641_v5 = vcombine.high %v2710_v45, %v2713_v46 }
  0xc2   : > { %v856_v7 = vcombine.low %v800_v49, %v832_v56  ;;  %v857_v9 = vcombine.high %v800_v49, %v832_v56  ;;  %v858_v10 = vcombine.low %v807_v55, %v839_v28  ;;  %v859_v11 = vcombine.high %v807_v55, %v839_v28 }
  0xc3   : > { %v623_v12 = vrot.slane %v609_v59, %v2624_v8  ;;  %v639_v13 = vrot.slane %v625_v4, %v2624_v8  ;;  %v655_v14 = vrot.slane %v641_v5, %v2624_v8  ;;  %v729_v16 = vcombine.high %v2718_v51, %v2730_v60 }
  0xc4   : > { %v1988_v29 = vpack.i.bf16 %v856_v7, %v720_v48  ;;  %v1993_v35 = vpack.i.bf16 %v857_v9, %v721_v53  ;;  %v1998_v17 = vpack.i.bf16 %v858_v10, %v722_v57  ;;  %v2003_v36 = vpack.i.bf16 %v859_v11, %v723_v30 }
  0xc5   : > { %v672_v37 = vcombine.low %v607_v58, %v623_v12  ;;  %v704_v18 = vcombine.low %v639_v13, %v655_v14  ;;  %v743_v45 = vrot.slane %v729_v16, %v2624_v8  ;;  %v745_v46 = vcombine.high %v2721_v52, %v2733_v61 }
  0xc6   : > { %1989 = vrot.lane.b32.xlu1 %v1988_v29, %s2261_s10  ;;  %1994 = vrot.lane.b32.xlu0 %v1993_v35, %s2262_s11  ;;  %v761_v19 = vcombine.high %v2736_v62, %v2742_v2  ;;  %v777_v51 = vcombine.high %v2739_v0, %v2745_v3  ;;  %v673_v60 = vcombine.high %v607_v58, %v623_v12  ;;  %v2265_v49 = vmov 0.0|0.0   ;;  %s2282_s10 = smov 80   ;;  %s2283_s11 = smov 84  }
  0xc7   : > { %v680_v20 = vrot.slane %v672_v37, %v2635_v22  ;;  %v712_v21 = vrot.slane %v704_v18, %v2635_v22  ;;  %v759_v23 = vrot.slane %v745_v46, %v2624_v8  ;;  %v705_v24 = vcombine.high %v639_v13, %v655_v14  ;;  %1799 = vmatprep.subr.bf16.mxu0 %v2265_v49 }
  0xc8   : > { %v775_v52 = vrot.slane %v761_v19, %v2624_v8  ;;  %v791_v61 = vrot.slane %v777_v51, %v2624_v8  ;;  %v687_v26 = vrot.slane %v673_v60, %v2635_v22  ;;  %1802 = vmatprep.subr.bf16.mxu1 %v2265_v49  ;;  %v2269_v56 = vmov 0.0  }
  0xc9   : > { %v808_v25 = vcombine.low %v743_v45, %v759_v23  ;;  %v719_v62 = vrot.slane %v705_v24, %v2635_v22  ;;  %v809_v2 = vcombine.high %v743_v45, %v759_v23  ;;  %v724_v27 = vcombine.low %v680_v20, %v712_v21  ;;  %1768 = vmatprep.mubr.msk.f32.mxu0 %vm2268_vm0, %v2269_v56 }
  0xca   : > { %1999 = vrot.lane.b32.xlu1 %v1998_v17, %s2263_s8  ;;  %2004 = vrot.lane.b32.xlu0 %v2003_v36, %s2264_s17  ;;  %v840_v0 = vcombine.low %v775_v52, %v791_v61  ;;  %v841_v3 = vcombine.high %v775_v52, %v791_v61  ;;  %v725_v33 = vcombine.high %v680_v20, %v712_v21  ;;  %vm1008_vm9 = vcmask 293888   ;;  %s2284_s8 = smov 72   ;;  %s2285_s17 = smov 76  }
  0xcb   : > { %v816_v31 = vrot.slane %v808_v25, %v2635_v22  ;;  %v823_v34 = vrot.slane %v809_v2, %v2635_v22  ;;  %v726_v39 = vcombine.low %v687_v26, %v719_v62  ;;  %v727_v40 = vcombine.high %v687_v26, %v719_v62  ;;  %1775 = vmatprep.mubr.msk.f32.mxu1 %vm2268_vm0, %v2269_v56 }
  0xcc   : > { %v848_v32 = vrot.slane %v840_v0, %v2635_v22  ;;  %v855_v38 = vrot.slane %v841_v3, %v2635_v22  ;;  %vm1011_vm10 = vcmask 326656   ;;  %vm1014_vm11 = vcmask 359424  }
  0xcd   : > { %vm1017_vm12 = vcmask 392192   ;;  %vm1020_vm13 = vcmask 424960   ;;  %vm1023_vm14 = vcmask 457728   ;;  %vm1026_vm15 = vcmask 490496  }
  0xce   : > { %v860_v41 = vcombine.low %v816_v31, %v848_v32  ;;  %v861_v42 = vcombine.high %v816_v31, %v848_v32  ;;  %v862_v43 = vcombine.low %v823_v34, %v855_v38  ;;  %v863_v44 = vcombine.high %v823_v34, %v855_v38 }
  0xd0   : > { %v2008_v47 = vpack.i.bf16 %v860_v41, %v724_v27  ;;  %v2013_v48 = vpack.i.bf16 %v861_v42, %v725_v33  ;;  %v2018_v53 = vpack.i.bf16 %v862_v43, %v726_v39  ;;  %v2023_v55 = vpack.i.bf16 %v863_v44, %v727_v40 }
  0xd2   : > { %2009 = vrot.lane.b32.xlu1 %v2008_v47, %s2266_s18  ;;  %2014 = vrot.lane.b32.xlu0 %v2013_v48, %s2267_s15  ;;  %s2286_s18 = smov 68  }
  0xd6   : > { %2019 = vrot.lane.b32.xlu1 %v2018_v53, %s2270_s9  ;;  %2024 = vrot.lane.b32.xlu0 %v2023_v55, %s2271_s23  ;;  %s1748_s23 = sshll.u32 %s2236_s30, 8  ;;  %s1576_s30 = scalar_lea.sflag [#allocation6], %s2600_s24 }
 0x124   : > { %v1955_v57 = vpop.permute.xlu0 %1954 }
 0x125   : > { %v1965_v28 = vpop.permute.xlu1 %1964  ;;  %v1957_v58 = vunpack.i.h.bf16 %v1955_v57  ;;  %v1956_v59 = vunpack.i.l.bf16 %v1955_v57 }
 0x126   : > { %v1967_v14 = vunpack.i.h.bf16 %v1965_v28  ;;  %v1966_v16 = vunpack.i.l.bf16 %v1965_v28 }
 0x127   : > { %v986_v10 = vsel %vm984_vm1, %v584_v15, %v1957_v58  ;;  %v985_v11 = vsel %vm984_vm1, %v448_v1, %v1956_v59  ;;  %vm1357_vm1 = vcmask 27648  }
 0x128   : > { %v1960_v30 = vpop.permute.xlu0 %1959 }
 0x129   : > { %v1962_v4 = vunpack.i.h.bf16 %v1960_v30  ;;  %v1961_v5 = vunpack.i.l.bf16 %v1960_v30 }
 0x12b   : > { %v988_v12 = vsel %vm987_vm2, %v985_v11, %v1961_v5  ;;  %v989_v13 = vsel %vm987_vm2, %v986_v10, %v1962_v4 }
 0x12c   : > { %v1970_v7 = vpop.permute.xlu1 %1969  ;;  %v1975_v9 = vpop.permute.xlu0 %1974  ;;  %v991_v17 = vsel %vm990_vm3, %v988_v12, %v1966_v16  ;;  %v992_v36 = vsel %vm990_vm3, %v989_v13, %v1967_v14 }
 0x12d   : > { %v1972_v29 = vunpack.i.h.bf16 %v1970_v7  ;;  %v1971_v35 = vunpack.i.l.bf16 %v1970_v7  ;;  %v1977_v45 = vunpack.i.h.bf16 %v1975_v9  ;;  %v1976_v46 = vunpack.i.l.bf16 %v1975_v9 }
 0x12f   : > { %v994_v63 = vsel %vm993_vm4, %v991_v17, %v1971_v35  ;;  %v995_v6 = vsel %vm993_vm4, %v992_v36, %v1972_v29  ;;  %v318_v35 = vld [vmem:[%s2604_s22] sm:$0xf]  ;;  %s2277_s22 = smov 108  }
 0x130   : > { %v1980_v37 = vpop.permute.xlu1 %1979  ;;  %v1985_v18 = vpop.permute.xlu0 %1984  ;;  %v997_v1 = vsel %vm996_vm5, %v994_v63, %v1976_v46  ;;  %v998_v15 = vsel %vm996_vm5, %v995_v6, %v1977_v45 }
 0x131   : > { %v1982_v50 = vunpack.i.h.bf16 %v1980_v37  ;;  %v1981_v54 = vunpack.i.l.bf16 %v1980_v37  ;;  %v1987_v19 = vunpack.i.h.bf16 %v1985_v18  ;;  %v1986_v51 = vunpack.i.l.bf16 %v1985_v18 }
 0x133   : > { %v1000_v21 = vsel %vm999_vm6, %v997_v1, %v1981_v54  ;;  %v1001_v23 = vsel %vm999_vm6, %v998_v15, %v1982_v50 }
 0x134   : > { %v1003_v61 = vsel %vm1002_vm7, %v1000_v21, %v1986_v51  ;;  %v1004_v25 = vsel %vm1002_vm7, %v1001_v23, %v1987_v19 }
 0x138   : > { %v1990_v60 = vpop.permute.xlu1 %1989  ;;  %v1995_v20 = vpop.permute.xlu0 %1994 }
 0x139   : > { %v1992_v24 = vunpack.i.h.bf16 %v1990_v60  ;;  %v1991_v52 = vunpack.i.l.bf16 %v1990_v60  ;;  %v1997_v26 = vunpack.i.h.bf16 %v1995_v20  ;;  %v1996_v62 = vunpack.i.l.bf16 %v1995_v20 }
 0x13b   : > { %v1006_v3 = vsel %vm1005_vm8, %v1003_v61, %v1991_v52  ;;  %v1007_v27 = vsel %vm1005_vm8, %v1004_v25, %v1992_v24 }
 0x13c   : > { %v2000_v0 = vpop.permute.xlu1 %1999  ;;  %v2005_v2 = vpop.permute.xlu0 %2004  ;;  %v1009_v33 = vsel %vm1008_vm9, %v1006_v3, %v1996_v62  ;;  %v1010_v34 = vsel %vm1008_vm9, %v1007_v27, %v1997_v26 }
 0x13d   : > { %v2002_v31 = vunpack.i.h.bf16 %v2000_v0  ;;  %v2001_v32 = vunpack.i.l.bf16 %v2000_v0  ;;  %v2007_v38 = vunpack.i.h.bf16 %v2005_v2  ;;  %v2006_v39 = vunpack.i.l.bf16 %v2005_v2 }
 0x13f   : > { %v1012_v40 = vsel %vm1011_vm10, %v1009_v33, %v2001_v32  ;;  %v1013_v41 = vsel %vm1011_vm10, %v1010_v34, %v2002_v31 }
 0x140   : > { %v1015_v42 = vsel %vm1014_vm11, %v1012_v40, %v2006_v39  ;;  %v1016_v43 = vsel %vm1014_vm11, %v1013_v41, %v2007_v38 }
 0x144   : > { %v2010_v44 = vpop.permute.xlu1 %2009  ;;  %v2015_v47 = vpop.permute.xlu0 %2014 }
 0x145   : > { %v2012_v48 = vunpack.i.h.bf16 %v2010_v44  ;;  %v2011_v53 = vunpack.i.l.bf16 %v2010_v44  ;;  %v2017_v55 = vunpack.i.h.bf16 %v2015_v47  ;;  %v2016_v57 = vunpack.i.l.bf16 %v2015_v47 }
 0x147   : > { %v1018_v28 = vsel %vm1017_vm12, %v1015_v42, %v2011_v53  ;;  %v1019_v30 = vsel %vm1017_vm12, %v1016_v43, %v2012_v48 }
 0x148   : > { %v1021_v58 = vsel %vm1020_vm13, %v1018_v28, %v2016_v57  ;;  %v1022_v59 = vsel %vm1020_vm13, %v1019_v30, %v2017_v55  ;;  %v2020_v4 = vpop.permute.xlu1 %2019  ;;  %v2025_v5 = vpop.permute.xlu0 %2024 }
 0x149   : > { %v2022_v7 = vunpack.i.h.bf16 %v2020_v4  ;;  %v2021_v9 = vunpack.i.l.bf16 %v2020_v4  ;;  %v2027_v10 = vunpack.i.h.bf16 %v2025_v5  ;;  %v2026_v11 = vunpack.i.l.bf16 %v2025_v5 }
 0x14b   : > { %v1024_v12 = vsel %vm1023_vm14, %v1021_v58, %v2021_v9  ;;  %v1025_v13 = vsel %vm1023_vm14, %v1022_v59, %v2022_v7 }
 0x14c   : > { %v1027_v14 = vsel %vm1026_vm15, %v1024_v12, %v2026_v11  ;;  %v1028_v16 = vsel %vm1026_vm15, %v1025_v13, %v2027_v10 }
 0x14d   : > { %v1800_v29 = vpack.c.bf16 %v1028_v16, %v1027_v14 }
 0x14f   : > { %1801 = vmatpush3.bf16.msra.mxu0 %v1800_v29  ;;  %v319_v29 = vld [vmem:[%s2611_s25] sm:$0xf]  ;;  %s1733_s25 = sshll.u32 %s2600_s24, 4 }
 0x150   : > { %1805 = vmatprep.subr.bf16.mxu0 %v2265_v49  ;;  %s284_s15 = scalar_lea.vmem [#allocation10], %s1733_s25 }
 0x151   : > { %s1590_s9 = sshll.u32 %s284_s15, 4  ;;  %s2853_s9 = int_to_ptr.vmem [resolvable:$true] %s1590_s9 }
 0x152   : > { %1769 = vmatmul.mubr.msk.f32.vlgmr.msra.gmra.mrb[0].mxu0 %vm993_vm4, %v318_v35 }
 0x153   : > { %1782 = vmatprep.mubr.msk.f32.mxu0 %vm2268_vm0, %v2269_v56 }
 0x225   : > { %v1098_v17 = vpop.f32.mrb[0].mxu0 }
 0x226   : > { %1106 = vrot.lane.b32.xlu0 %v1098_v17, %s2272_s13  ;;  %1103 = vrot.lane.b32.xlu1 %v1098_v17, %s2273_s2  ;;  %v1770_v36 = vpop.f32.mrb[1].mxu0 }
 0x22a   : > { %1112 = vrot.lane.b32.xlu0 %v1098_v17, %s2274_s16  ;;  %1109 = vrot.lane.b32.xlu1 %v1098_v17, %s2275_s14  ;;  %s2958_s16 = sld [smem:[#allocation24_spill]] }
 0x22e   : > { %1118 = vrot.lane.b32.xlu0 %v1098_v17, %s2276_s19  ;;  %1115 = vrot.lane.b32.xlu1 %v1098_v17, %s2277_s22  ;;  %s2128_s19 = scalar_lea.vmem %s2853_s9, 256  ;;  %s2287_s22 = smov [#allocation10]  }
 0x22f   : > { %p2129_p11 = scmp.ne.s32.totalorder %s2853_s9, %s2128_s19 }
 0x230   : > { %s2858_s14 = scalar_lea.hbm %s2958_s16, %s1748_s23 }
 0x231   : > { %p2130_p7 = pnand %p2129_p11, %p2959_p6 }
 0x232   : > { %1124 = vrot.lane.b32.xlu0 %v1098_v17, %s2278_s4  ;;  %1121 = vrot.lane.b32.xlu1 %v1098_v17, %s2279_s28  ;;  %s2132_s4 = sshll.u32 %s2287_s22, 4  ;;  %s2133_s4 = int_to_ptr.vmem [resolvable:$false] %s2132_s4 }
 0x233   : > { %p2131_p12 = pneg %p2130_p7  ;;  %s2134_s28 = scalar_lea.vmem %s2133_s4, 512 }
 0x234   : > { %p2135_p0 = scmp.lt.s32.totalorder %s2853_s9, %s2133_s4  ;;  %p2136_p8 = scmp.lt.s32.totalorder %s2134_s28, %s2128_s19 }
 0x236   : > { %1130 = vrot.lane.b32.xlu0 %v1098_v17, %s2280_s21  ;;  %1127 = vrot.lane.b32.xlu1 %v1098_v17, %s2281_s12  ;;  %p2137_p3 = por %p2136_p8, %p2135_p0 }
 0x238   : > { %p2138_p1 = pnand %p2137_p3, %p2131_p12 }
 0x23a   : > { %1136 = vrot.lane.b32.xlu0 %v1098_v17, %s2282_s10  ;;  %1133 = vrot.lane.b32.xlu1 %v1098_v17, %s2283_s11 }
 0x23e   : > { %1142 = vrot.lane.b32.xlu0 %v1098_v17, %s2284_s8  ;;  %1139 = vrot.lane.b32.xlu1 %v1098_v17, %s2285_s17 }
 0x242   : > { %1145 = vrot.lane.b32.xlu1 %v1098_v17, %s2286_s18 }
 0x298   : > { %v1107_v37 = vpop.permute.xlu0 %1106  ;;  %v1104_v18 = vpop.permute.xlu1 %1103 }
 0x299   : > { %v1148_v24 = vcombine.low %v1098_v17, %v1107_v37 }
 0x29b   : > { %v1155_v27 = vrot.slane %v1148_v24, %v2624_v8 }
 0x29c   : > { %v1113_v45 = vpop.permute.xlu0 %1112  ;;  %v1110_v46 = vpop.permute.xlu1 %1109 }
 0x29d   : > { %v1156_v20 = vcombine.low %v1104_v18, %v1110_v46 }
 0x29f   : > { %v1163_v62 = vrot.slane %v1156_v20, %v2624_v8 }
 0x2a0   : > { %v1119_v63 = vpop.permute.xlu0 %1118  ;;  %v1116_v6 = vpop.permute.xlu1 %1115 }
 0x2a1   : > { %v1164_v21 = vcombine.low %v1113_v45, %v1119_v63  ;;  %v1180_v38 = vcombine.low %v1155_v27, %v1163_v62  ;;  %v1181_v53 = vcombine.high %v1155_v27, %v1163_v62 }
 0x2a3   : > { %v1171_v0 = vrot.slane %v1164_v21, %v2624_v8  ;;  %v1188_v55 = vrot.slane %v1180_v38, %v2635_v22  ;;  %v1195_v9 = vrot.slane %v1181_v53, %v2635_v22 }
 0x2a4   : > { %v1125_v50 = vpop.permute.xlu0 %1124  ;;  %v1122_v54 = vpop.permute.xlu1 %1121 }
 0x2a5   : > { %v1172_v19 = vcombine.low %v1116_v6, %v1122_v54 }
 0x2a7   : > { %v1179_v52 = vrot.slane %v1172_v19, %v2624_v8 }
 0x2a8   : > { %v1131_v1 = vpop.permute.xlu0 %1130  ;;  %v1128_v15 = vpop.permute.xlu1 %1127 }
 0x2a9   : > { %v1216_v26 = vcombine.low %v1125_v50, %v1131_v1  ;;  %v1196_v31 = vcombine.low %v1171_v0, %v1179_v52  ;;  %v1197_v42 = vcombine.high %v1171_v0, %v1179_v52 }
 0x2ab   : > { %v1223_v33 = vrot.slane %v1216_v26, %v2624_v8  ;;  %v1204_v43 = vrot.slane %v1196_v31, %v2635_v22  ;;  %v1211_v58 = vrot.slane %v1197_v42, %v2635_v22 }
 0x2ac   : > { %v1137_v51 = vpop.permute.xlu0 %1136  ;;  %v1134_v60 = vpop.permute.xlu1 %1133 }
 0x2ad   : > { %v1224_v23 = vcombine.low %v1128_v15, %v1134_v60  ;;  %v1212_v59 = vcombine.low %v1188_v55, %v1204_v43  ;;  %v1213_v4 = vcombine.high %v1188_v55, %v1204_v43  ;;  %v1214_v14 = vcombine.low %v1195_v9, %v1211_v58 }
 0x2ae   : > { %v1215_v16 = vcombine.high %v1195_v9, %v1211_v58 }
 0x2af   : > { %v1231_v2 = vrot.slane %v1224_v23, %v2624_v8 }
 0x2b0   : > { %v1143_v61 = vpop.permute.xlu0 %1142  ;;  %v1140_v25 = vpop.permute.xlu1 %1139 }
 0x2b1   : > { %v1232_v3 = vcombine.low %v1137_v51, %v1143_v61  ;;  %v1248_v39 = vcombine.low %v1223_v33, %v1231_v2  ;;  %v1249_v44 = vcombine.high %v1223_v33, %v1231_v2 }
 0x2b3   : > { %v1239_v40 = vrot.slane %v1232_v3, %v2624_v8  ;;  %v1256_v28 = vrot.slane %v1248_v39, %v2635_v22 }
 0x2b4   : > { %v1146_v32 = vpop.permute.xlu1 %1145 }
 0x2b5   : > { %v1240_v34 = vcombine.low %v1140_v25, %v1146_v32 }
 0x2b7   : > { %v1247_v41 = vrot.slane %v1240_v34, %v2624_v8  ;;  %v1263_v8 = vrot.slane %v1249_v44, %v2635_v22 }
 0x2b9   : > { %v1264_v47 = vcombine.low %v1239_v40, %v1247_v41  ;;  %v1265_v48 = vcombine.high %v1239_v40, %v1247_v41 }
 0x2bb   : > { %v1279_v57 = vrot.slane %v1265_v48, %v2635_v22  ;;  %v1272_v30 = vrot.slane %v1264_v47, %v2635_v22 }
 0x2bd   : > { %v1280_v5 = vcombine.low %v1256_v28, %v1272_v30  ;;  %v1281_v7 = vcombine.high %v1256_v28, %v1272_v30  ;;  %v1282_v10 = vcombine.low %v1263_v8, %v1279_v57  ;;  %v1283_v11 = vcombine.high %v1263_v8, %v1279_v57 }
 0x2bf   : > { %v1803_v12 = vpack.c.bf16 %v1280_v5, %v1212_v59  ;;  %v1806_v13 = vpack.c.bf16 %v1281_v7, %v1213_v4  ;;  %v1809_v35 = vpack.c.bf16 %v1282_v10, %v1214_v14  ;;  %v1812_v17 = vpack.c.bf16 %v1283_v11, %v1215_v16 }
 0x2c1   : > { %1804 = vmatpush3.bf16.msra.mxu1 %v1803_v12  ;;  %1807 = vmatpush3.bf16.msra.mxu0 %v1806_v13 }
 0x2c2   : > { %1808 = vmatprep.subr.bf16.mxu1 %v2265_v49  ;;  %1811 = vmatprep.subr.bf16.mxu0 %v2265_v49 }
 0x2c4   : > { %1776 = vmatmul.mubr.msk.f32.vlgmr.msra.gmra.mrb[0].mxu1 %vm993_vm4, %v319_v29  ;;  %1783 = vmatmul.mubr.msk.f32.vlgmr.msra.gmra.mrb[2].mxu0 %vm993_vm4, %v319_v29 }
 0x2c5   : > { %1810 = vmatpush3.bf16.msra.mxu1 %v1809_v35  ;;  %1813 = vmatpush3.bf16.msra.mxu0 %v1812_v17 }
 0x2c6   : > { %1789 = vmatprep.mubr.msk.f32.mxu1 %vm2268_vm0, %v2269_v56  ;;  %1796 = vmatprep.mubr.msk.f32.mxu0 %vm2268_vm0, %v2269_v56 }
 0x2c8   : > { %1790 = vmatmul.mubr.msk.f32.vlgmr.msra.gmra.mrb[2].mxu1 %vm993_vm4, %v319_v29  ;;  %1797 = vmatmul.mubr.msk.f32.vlgmr.msra.gmra.mrb[4].mxu0 %vm993_vm4, %v319_v29 }
 0x397   : > { %v1353_v22 = vpop.f32.mrb[0].mxu1  ;;  %v1425_v49 = vpop.f32.mrb[2].mxu0 }
 0x398   : > { %1358 = vst.msk [vmem:[%s284_s15] sm:$0xf] %vm1357_vm1, %v1353_v22  ;;  %1737 = vst.msk [vmem:[%s284_s15 + $0x4] sm:$0xf] %vm1357_vm1, %v1425_v49  ;;  %v1777_v36 = vpop.f32.mrb[1].mxu1  ;;  %v1784_v37 = vpop.f32.mrb[3].mxu0 }
 0x39b   : > { %v1497_v56 = vpop.f32.mrb[2].mxu1  ;;  %v1569_v18 = vpop.f32.mrb[4].mxu0 }
 0x39c   : > { %1739 = vst.msk [vmem:[%s284_s15 + $0x8] sm:$0xf] %vm1357_vm1, %v1497_v56  ;;  %1741 = vst.msk [vmem:[%s284_s15 + $0xc] sm:$0xf] %vm1357_vm1, %v1569_v18  ;;  %v1791_v45 = vpop.f32.mrb[3].mxu1  ;;  %v1798_v46 = vpop.f32.mrb[5].mxu0 }
 0x39d   : > { %2141 = shalt.err (!%p2138_p1)
}
 0x39e   : > { %s2142_s21 = scalar_lea.hbm %s2858_s14, 256  ;;  %s2146_s11 = scalar_lea.hbm %s2958_s16, 1024 }
 0x39f   : > { %p2143_p5 = scmp.ne.s32.totalorder %s2858_s14, %s2142_s21  ;;  %p2147_p13 = scmp.lt.u32.totalorder %s2858_s14, %s2958_s16 }
 0x3a0   : > { %p2148_p9 = scmp.lt.u32.totalorder %s2146_s11, %s2142_s21  ;;  %p2150_p11 = scmp.lt.u32.totalorder %s2142_s21, %s2858_s14 }
 0x3a1   : > { %p2144_p2 = pnand %p2143_p5, %p2959_p6 }
 0x3a2   : > { %p2149_p4 = por %p2148_p9, %p2147_p13 }
 0x3a3   : > { %p2145_p10 = pneg %p2144_p2 }
 0x3a4   : > { %p2151_p7 = por %p2150_p11, %p2149_p4 }
 0x3a6   : > { %p2152_p12 = pnand %p2151_p7, %p2145_p10 }
 0x3a8   : > { %2155 = shalt.err (!%p2152_p12)
}
 0x3a9   : > { %s2288_s18 = smov 64  }
 0x3aa   : > { %1822 = dma.vmem_to_hbm [thread:$0]  (%p2959_p6), %s2853_s9, 256, %s2858_s14, %s1576_s30, %s2288_s18, %s2288_s18, %s2254_s7  }
 0x3ab PF: > { %s2960_s25 = sld [smem:[#allocation18_spill]]  ;;  %s2961_s15 = sld [smem:[#allocation21_spill]] }
 0x3ac   : > { %p1841_p0 = scmp.ge.s32.totalorder %s2244_s6, 2 }
 0x3b1   : > { %s1605_s23 = sand.u32 1, %s2960_s25   ;;  %p2962_p8 = scmp.ne.s32.totalorder %s2961_s15, 0 }
 0x3b2   : > { %s1606_s13 = scalar_lea.sflag [#allocation6], %s1605_s23 }
 0x3b3   : > { %p1837_p3 = pnand %p1841_p0, %p2962_p8 }
 0x3b5   : > { %2207 = dma.done.wait (!%p1837_p3), %s1606_s13, 256  }
 0x3b6   : > { %2209 = vsyncadd (!%p1837_p3), %s1606_s13, 4294967040  ;;  %s27_s6 = sadd.s32 1, %s2244_s6   ;;  %s2963_s20 = sld [smem:[#allocation22_spill]] }
 0x3b7   : > { %p24_p1 = scmp.ge.s32.totalorder %s27_s6, 6   ;;  %s2964_s24 = sld [smem:[#allocation20_spill]] }
 0x3b8   : > { %s2965_s7 = sld [smem:[#allocation19_spill]]  ;;  %s2966_s25 = smov %s2216_s26 }
 0x3b9   : > { %s2967_s26 = smov %s2220_s27  ;;  %s2969_s28 = smov %s2228_s29 }
 0x3ba   : > { %s2970_s29 = smov %s2232_s0  ;;  %s2972_s30 = smov %s2240_s5 }
 0x3bb   :  { %26 = sbr.rel (!%p24_p1) target bundleno = 23 (0x17), region = 104 }
 0x3bc   : > { %s2968_s27 = smov %s2963_s20 }
 0x3bd   : > { %s2971_s0 = smov %s2964_s24 }
 0x3be   : > { %s2973_s5 = smov %s2965_s7 }
 0x3c2   :  { %1611 = vsyncpa [#allocation5], 1 }
 0x3c3   :  { %1613 = vsyncpa [#allocation5 + $0x1], 1 }
 0x3c4   :  { %1614 = vsyncpa [#allocation8], 1 }
 0x3c5   :  { %1616 = vsyncpa [#allocation8 + $0x1], 1 }
 0x3c6   :  { %1617 = vsyncpa [#allocation6], 1 }
 0x3c7   :  { %1619 = vsyncpa [#allocation6 + $0x1], 1 }

</bundles_post_ra>
